<compile_context>
chip_gen: v7x
topology: tpu7x:2x2x1
jax: 0.10.0
libtpu: 0.0.40
codegen_flags: <defaults>
</compile_context>

<pallas_src>
import functools

import jax
import jax.numpy as jnp
from jax import lax
from jax.experimental import pallas as pl
from jax.experimental.pallas import tpu as pltpu


# ----------------------------- "config" (deterministic, in-script) -----------------------------
NUM_CLASSES = 4
FEATURE_DIM = 32
BATCH = 8

FOCAL_ALPHA = [0.25, 0.50, 0.75, 1.00]     # per-class alpha, len == NUM_CLASSES
FOCAL_GAMMA = 2.0
LABEL_SMOOTHING = 0.1
CLASS_WEIGHTS = [1.0, 2.0, 1.5, 1.0]       # per-class CE weights, len == NUM_CLASSES
USE_COMBINED_LOSS = True
CONTRASTIVE_WEIGHT = 0.5
SIM_BF16 = False   # bf16-in/f32-acc MXU for the contrastive Gram (~1e-3 rel error if True)


# ----------------------------- Pallas kernel -----------------------------
def _combined_loss_kernel(*refs, focal_alpha, class_weights, label_smoothing,
                          focal_gamma, contrastive_weight, use_contrastive,
                          sim_bf16):
    if use_contrastive:
        logits_ref, tgt_row_ref, tgt_col_ref, feat_ref, out_ref = refs
    else:
        logits_ref, tgt_row_ref, out_ref = refs

    # Layout: class dim on sublanes, batch on lanes.
    logits = logits_ref[...].astype(jnp.float32)         # (C, B)
    tgt_row = tgt_row_ref[...]                            # (1, B) int32

    C, B = logits.shape

    # ---- one-hot mask built in-kernel (VPU iota + compare) ----
    cls = lax.broadcasted_iota(jnp.int32, (C, B), 0)      # class index per row
    onehot = (cls == tgt_row).astype(jnp.float32)         # (C, B)

    # ---- log-softmax over the class (sublane) axis ----
    m = jnp.max(logits, axis=0, keepdims=True)            # (1, B)
    z = logits - m
    lse = jnp.log(jnp.sum(jnp.exp(z), axis=0, keepdims=True))
    logp = z - lse                                         # (C, B)

    nll = -jnp.sum(onehot * logp, axis=0, keepdims=True)   # (1, B)  -log p_y
    sum_neglogp = -jnp.sum(logp, axis=0, keepdims=True)    # (1, B)

    # ---- focal loss (CE with label smoothing, reduction='none') ----
    eps = label_smoothing
    ce_smooth = (1.0 - eps) * nll + (eps / C) * sum_neglogp   # (1, B)
    pt = jnp.exp(-ce_smooth)
    one_minus_pt = jnp.maximum(1.0 - pt, 0.0)   # clamp: fp error can make pt > 1

    # integer gamma -> plain VPU multiplies (float pow would be exp(g*log(x)) on EUP)
    if float(focal_gamma) == int(focal_gamma) and focal_gamma >= 1:
        focal_factor = one_minus_pt
        for _ in range(int(focal_gamma) - 1):
            focal_factor = focal_factor * one_minus_pt
    elif focal_gamma == 0:
        focal_factor = jnp.ones_like(one_minus_pt)
    else:
        focal_factor = one_minus_pt ** focal_gamma

    # per-class alpha / CE weights baked in as compile-time select chains
    # (alpha gathered by the hard label only — matches the PyTorch reference).
    # NOTE: out-of-range targets silently get alpha=weight=0 (PyTorch would raise).
    tgt_alpha = jnp.zeros_like(nll)                         # (1, B)
    tgt_w = jnp.zeros_like(nll)                             # (1, B)
    for c in range(C):
        mask = tgt_row == c                                 # one vcmp per class, reused
        tgt_alpha = jnp.where(mask, float(focal_alpha[c]), tgt_alpha)
        tgt_w = jnp.where(mask, float(class_weights[c]), tgt_w)

    focal = jnp.sum(tgt_alpha * focal_factor * ce_smooth) * (1.0 / float(B))

    # ---- class-weighted cross entropy (PyTorch: sum(w_y * nll) / sum(w_y)) ----
    ce_weighted = jnp.sum(tgt_w * nll) / jnp.sum(tgt_w)

    total = 0.7 * focal + 0.3 * ce_weighted

    # ---- contrastive loss on L2-normalized features ----
    if use_contrastive:
        feats = feat_ref[...].astype(jnp.float32)           # (B, D)
        sumsq = jnp.sum(feats * feats, axis=-1, keepdims=True)          # (B, 1)
        fn = feats * lax.rsqrt(jnp.maximum(sumsq, 1e-24))   # F.normalize(p=2, dim=1)

        # contract the last dim of both operands -> no explicit .T / XLU transpose
        dims = (((1,), (1,)), ((), ()))
        fn_mm = fn.astype(jnp.bfloat16) if sim_bf16 else fn
        sim = lax.dot_general(fn_mm, fn_mm, dims,
                              preferred_element_type=jnp.float32)       # (B, B)

        # label_mat via pure VPU integer compare (no one-hot Gram matmul)
        tgt_col = tgt_col_ref[...]                                       # (B, 1) int32
        label_mat = (tgt_col == tgt_row).astype(jnp.float32)             # (B, B)

        pos_loss = (1.0 - sim) * label_mat
        neg_loss = jnp.maximum(sim - 0.5, 0.0) * (1.0 - label_mat)
        cont = (jnp.sum(pos_loss) + jnp.sum(neg_loss)) * (1.0 / float(B * B))
        total = total + contrastive_weight * cont

    out_ref[0, 0] = total


def combined_loss(logits, targets, features=None):
    """JAX wrapper mirroring CombinedLoss.forward(logits, targets, features)."""
    B, C = logits.shape
    assert C == NUM_CLASSES, f"expected C == {NUM_CLASSES}, got {C}"
    assert len(FOCAL_ALPHA) == C and len(CLASS_WEIGHTS) == C

    # Lane-dense layout transforms (wrapper-side plumbing, not compute):
    logits_cb = jnp.transpose(logits)                      # (C, B): class->sublanes, batch->lanes
    tgt_i32 = targets.astype(jnp.int32)
    tgt_row = tgt_i32.reshape(1, B)                        # lane-major row of labels

    use_contrastive = (features is not None) and USE_COMBINED_LOSS

    kernel = functools.partial(
        _combined_loss_kernel,
        focal_alpha=tuple(FOCAL_ALPHA),
        class_weights=tuple(CLASS_WEIGHTS),
        label_smoothing=LABEL_SMOOTHING,
        focal_gamma=FOCAL_GAMMA,
        contrastive_weight=CONTRASTIVE_WEIGHT,
        use_contrastive=use_contrastive,
        sim_bf16=SIM_BF16,
    )

    vmem = pl.BlockSpec(memory_space=pltpu.MemorySpace.VMEM)
    out_spec = pl.BlockSpec(memory_space=pltpu.MemorySpace.SMEM)
    out_shape = jax.ShapeDtypeStruct((1, 1), jnp.float32)

    if use_contrastive:
        tgt_col = tgt_i32.reshape(B, 1)                    # column copy for the label_mat compare
        out = pl.pallas_call(
            kernel,
            out_shape=out_shape,
            in_specs=[vmem,   # logits   (C, B)
                      vmem,   # targets  (1, B) int32
                      vmem,   # targets  (B, 1) int32
                      vmem],  # features (B, D)
            out_specs=out_spec,
        )(logits_cb, tgt_row, tgt_col, features)
    else:
        # separate variant: no dead features DMA / pipelined buffer
        out = pl.pallas_call(
            kernel,
            out_shape=out_shape,
            in_specs=[vmem, vmem],
            out_specs=out_spec,
        )(logits_cb, tgt_row)
    return out[0, 0]


# ----------------------------- pure-JAX reference (for verification) -----------------------------
def combined_loss_ref(logits, targets, features):
    logits = logits.astype(jnp.float32)
    B, C = logits.shape
    logp = jax.nn.log_softmax(logits, axis=-1)
    onehot = jax.nn.one_hot(targets, C, dtype=jnp.float32)
    nll = -jnp.sum(onehot * logp, axis=-1)
    sum_neglogp = -jnp.sum(logp, axis=-1)
    eps = LABEL_SMOOTHING
    ce_smooth = (1.0 - eps) * nll + (eps / C) * sum_neglogp
    pt = jnp.exp(-ce_smooth)
    alpha = jnp.asarray(FOCAL_ALPHA, jnp.float32)
    focal = jnp.mean(alpha[targets] * (1.0 - pt) ** FOCAL_GAMMA * ce_smooth)
    cw = jnp.asarray(CLASS_WEIGHTS, jnp.float32)
    w_t = cw[targets]
    ce_weighted = jnp.sum(w_t * nll) / jnp.sum(w_t)
    total = 0.7 * focal + 0.3 * ce_weighted
    if features is not None and USE_COMBINED_LOSS:
        fnorm = features / jnp.maximum(
            jnp.sqrt(jnp.sum(features * features, axis=-1, keepdims=True)), 1e-12)
        sim = fnorm @ fnorm.T
        label_mat = (targets[:, None] == targets[None, :]).astype(jnp.float32)
        pos = (1.0 - sim) * label_mat
        neg = jnp.maximum(sim - 0.5, 0.0) * (1.0 - label_mat)
        total = total + CONTRASTIVE_WEIGHT * (jnp.sum(pos) + jnp.sum(neg)) / (B * B)
    return total


if __name__ == "__main__":
    key = jax.random.PRNGKey(0)
    k1, k2, k3 = jax.random.split(key, 3)

    logits = jax.random.normal(k1, (BATCH, NUM_CLASSES), dtype=jnp.float32)
    targets = jax.random.randint(k2, (BATCH,), 0, NUM_CLASSES, dtype=jnp.int32)
    features = jax.random.normal(k3, (BATCH, FEATURE_DIM), dtype=jnp.float32)

    loss = combined_loss(logits, targets, features)
    loss = jax.block_until_ready(loss)

    ref = combined_loss_ref(logits, targets, features)
    tol = 1e-3 if SIM_BF16 else 1e-5
    assert jnp.allclose(loss, ref, rtol=tol, atol=tol), (loss, ref)

    # also exercise the no-features variant (focal + weighted CE only)
    loss_nf = jax.block_until_ready(combined_loss(logits, targets, None))
    ref_nf = combined_loss_ref(logits, targets, None)
    assert jnp.allclose(loss_nf, ref_nf, rtol=1e-5, atol=1e-5), (loss_nf, ref_nf)

    print("KERNEL_OK")
</pallas_src>

<mosaic_0001>
module attributes {stable_mosaic.version = 11 : i64} {
  func.func @_combined_loss_kernel(%arg0: memref<4x8xf32, #tpu.memory_space<vmem>>, %arg1: memref<1x8xi32, #tpu.memory_space<vmem>>, %arg2: memref<8x1xi32, #tpu.memory_space<vmem>>, %arg3: memref<8x32xf32, #tpu.memory_space<vmem>>, %arg4: memref<1x1xf32, #tpu.memory_space<smem>>) attributes {dimension_semantics = [], scalar_prefetch = 0 : i64, scratch_operands = 0 : i64, tpu.core_type = #tpu.core_type<tc>} {
    %c0 = arith.constant 0 : index
    %c0_0 = arith.constant 0 : index
    %0 = vector.load %arg0[%c0, %c0_0] : memref<4x8xf32, #tpu.memory_space<vmem>>, vector<4x8xf32>
    %c0_1 = arith.constant 0 : index
    %c0_2 = arith.constant 0 : index
    %1 = vector.load %arg1[%c0_1, %c0_2] : memref<1x8xi32, #tpu.memory_space<vmem>>, vector<1x8xi32>
    %2 = tpu.iota {dimensions = array<i32: 0>} : vector<4x8xi32>
    %3 = vector.broadcast %1 : vector<1x8xi32> to vector<4x8xi32>
    %4 = arith.cmpi eq, %2, %3 : vector<4x8xi32>
    %5 = arith.extui %4 : vector<4x8xi1> to vector<4x8xi32>
    %6 = arith.sitofp %5 : vector<4x8xi32> to vector<4x8xf32>
    %cst = arith.constant dense<0xFF800000> : vector<8xf32>
    %7 = vector.multi_reduction <maximumf>, %0, %cst [0] : vector<4x8xf32> to vector<8xf32>
    %8 = vector.shape_cast %7 : vector<8xf32> to vector<1x8xf32>
    %9 = vector.broadcast %8 : vector<1x8xf32> to vector<4x8xf32>
    %10 = arith.subf %0, %9 : vector<4x8xf32>
    %11 = math.exp %10 : vector<4x8xf32>
    %cst_3 = arith.constant dense<0.000000e+00> : vector<8xf32>
    %12 = vector.multi_reduction <add>, %11, %cst_3 [0] : vector<4x8xf32> to vector<8xf32>
    %13 = vector.shape_cast %12 : vector<8xf32> to vector<1x8xf32>
    %14 = math.log %13 : vector<1x8xf32>
    %15 = vector.broadcast %14 : vector<1x8xf32> to vector<4x8xf32>
    %16 = arith.subf %10, %15 : vector<4x8xf32>
    %17 = arith.mulf %6, %16 : vector<4x8xf32>
    %cst_4 = arith.constant dense<0.000000e+00> : vector<8xf32>
    %18 = vector.multi_reduction <add>, %17, %cst_4 [0] : vector<4x8xf32> to vector<8xf32>
    %19 = vector.shape_cast %18 : vector<8xf32> to vector<1x8xf32>
    %cst_5 = arith.constant 0.000000e+00 : f32
    %20 = vector.broadcast %cst_5 : f32 to vector<1x8xf32>
    %21 = arith.subf %20, %19 : vector<1x8xf32>
    %cst_6 = arith.constant dense<0.000000e+00> : vector<8xf32>
    %22 = vector.multi_reduction <add>, %16, %cst_6 [0] : vector<4x8xf32> to vector<8xf32>
    %23 = vector.shape_cast %22 : vector<8xf32> to vector<1x8xf32>
    %cst_7 = arith.constant 0.000000e+00 : f32
    %24 = vector.broadcast %cst_7 : f32 to vector<1x8xf32>
    %25 = arith.subf %24, %23 : vector<1x8xf32>
    %cst_8 = arith.constant 0.899999976 : f32
    %26 = vector.broadcast %cst_8 : f32 to vector<1x8xf32>
    %27 = arith.mulf %26, %21 : vector<1x8xf32>
    %cst_9 = arith.constant 2.500000e-02 : f32
    %28 = vector.broadcast %cst_9 : f32 to vector<1x8xf32>
    %29 = arith.mulf %28, %25 : vector<1x8xf32>
    %30 = arith.addf %27, %29 : vector<1x8xf32>
    %cst_10 = arith.constant 0.000000e+00 : f32
    %31 = vector.broadcast %cst_10 : f32 to vector<1x8xf32>
    %32 = arith.subf %31, %30 : vector<1x8xf32>
    %33 = math.exp %32 : vector<1x8xf32>
    %cst_11 = arith.constant 1.000000e+00 : f32
    %34 = vector.broadcast %cst_11 : f32 to vector<1x8xf32>
    %35 = arith.subf %34, %33 : vector<1x8xf32>
    %cst_12 = arith.constant 0.000000e+00 : f32
    %36 = vector.broadcast %cst_12 : f32 to vector<1x8xf32>
    %37 = arith.maximumf %35, %36 : vector<1x8xf32>
    %38 = arith.mulf %37, %37 : vector<1x8xf32>
    %cst_13 = arith.constant 0.000000e+00 : f32
    %39 = vector.broadcast %cst_13 : f32 to vector<1x8xf32>
    %cst_14 = arith.constant 0.000000e+00 : f32
    %40 = vector.broadcast %cst_14 : f32 to vector<1x8xf32>
    %c0_i32 = arith.constant 0 : i32
    %41 = vector.broadcast %c0_i32 : i32 to vector<1x8xi32>
    %42 = arith.cmpi eq, %1, %41 : vector<1x8xi32>
    %cst_15 = arith.constant 2.500000e-01 : f32
    %43 = vector.broadcast %cst_15 : f32 to vector<1x8xf32>
    %44 = arith.select %42, %43, %39 : vector<1x8xi1>, vector<1x8xf32>
    %cst_16 = arith.constant 1.000000e+00 : f32
    %45 = vector.broadcast %cst_16 : f32 to vector<1x8xf32>
    %46 = arith.select %42, %45, %40 : vector<1x8xi1>, vector<1x8xf32>
    %c1_i32 = arith.constant 1 : i32
    %47 = vector.broadcast %c1_i32 : i32 to vector<1x8xi32>
    %48 = arith.cmpi eq, %1, %47 : vector<1x8xi32>
    %cst_17 = arith.constant 5.000000e-01 : f32
    %49 = vector.broadcast %cst_17 : f32 to vector<1x8xf32>
    %50 = arith.select %48, %49, %44 : vector<1x8xi1>, vector<1x8xf32>
    %cst_18 = arith.constant 2.000000e+00 : f32
    %51 = vector.broadcast %cst_18 : f32 to vector<1x8xf32>
    %52 = arith.select %48, %51, %46 : vector<1x8xi1>, vector<1x8xf32>
    %c2_i32 = arith.constant 2 : i32
    %53 = vector.broadcast %c2_i32 : i32 to vector<1x8xi32>
    %54 = arith.cmpi eq, %1, %53 : vector<1x8xi32>
    %cst_19 = arith.constant 7.500000e-01 : f32
    %55 = vector.broadcast %cst_19 : f32 to vector<1x8xf32>
    %56 = arith.select %54, %55, %50 : vector<1x8xi1>, vector<1x8xf32>
    %cst_20 = arith.constant 1.500000e+00 : f32
    %57 = vector.broadcast %cst_20 : f32 to vector<1x8xf32>
    %58 = arith.select %54, %57, %52 : vector<1x8xi1>, vector<1x8xf32>
    %c3_i32 = arith.constant 3 : i32
    %59 = vector.broadcast %c3_i32 : i32 to vector<1x8xi32>
    %60 = arith.cmpi eq, %1, %59 : vector<1x8xi32>
    %cst_21 = arith.constant 1.000000e+00 : f32
    %61 = vector.broadcast %cst_21 : f32 to vector<1x8xf32>
    %62 = arith.select %60, %61, %56 : vector<1x8xi1>, vector<1x8xf32>
    %cst_22 = arith.constant 1.000000e+00 : f32
    %63 = vector.broadcast %cst_22 : f32 to vector<1x8xf32>
    %64 = arith.select %60, %63, %58 : vector<1x8xi1>, vector<1x8xf32>
    %65 = arith.mulf %62, %38 : vector<1x8xf32>
    %66 = arith.mulf %65, %30 : vector<1x8xf32>
    %67 = vector.shape_cast %66 : vector<1x8xf32> to vector<1x1x8xf32>
    %cst_23 = arith.constant dense<0.000000e+00> : vector<1xf32>
    %68 = vector.multi_reduction <add>, %67, %cst_23 [1, 2] : vector<1x1x8xf32> to vector<1xf32>
    %69 = vector.shape_cast %68 : vector<1xf32> to vector<1x1x1xf32>
    %70 = vector.extract %69[0, 0, 0] : f32 from vector<1x1x1xf32>
    %cst_24 = arith.constant 1.250000e-01 : f32
    %71 = arith.mulf %70, %cst_24 : f32
    %72 = arith.mulf %64, %21 : vector<1x8xf32>
    %73 = vector.shape_cast %72 : vector<1x8xf32> to vector<1x1x8xf32>
    %cst_25 = arith.constant dense<0.000000e+00> : vector<1xf32>
    %74 = vector.multi_reduction <add>, %73, %cst_25 [1, 2] : vector<1x1x8xf32> to vector<1xf32>
    %75 = vector.shape_cast %74 : vector<1xf32> to vector<1x1x1xf32>
    %76 = vector.extract %75[0, 0, 0] : f32 from vector<1x1x1xf32>
    %77 = vector.shape_cast %64 : vector<1x8xf32> to vector<1x1x8xf32>
    %cst_26 = arith.constant dense<0.000000e+00> : vector<1xf32>
    %78 = vector.multi_reduction <add>, %77, %cst_26 [1, 2] : vector<1x1x8xf32> to vector<1xf32>
    %79 = vector.shape_cast %78 : vector<1xf32> to vector<1x1x1xf32>
    %80 = vector.extract %79[0, 0, 0] : f32 from vector<1x1x1xf32>
    %81 = arith.divf %76, %80 : f32
    %cst_27 = arith.constant 0.699999988 : f32
    %82 = arith.mulf %cst_27, %71 : f32
    %cst_28 = arith.constant 3.000000e-01 : f32
    %83 = arith.mulf %cst_28, %81 : f32
    %84 = arith.addf %82, %83 : f32
    %c0_29 = arith.constant 0 : index
    %c0_30 = arith.constant 0 : index
    %85 = vector.load %arg3[%c0_29, %c0_30] : memref<8x32xf32, #tpu.memory_space<vmem>>, vector<8x32xf32>
    %86 = arith.mulf %85, %85 : vector<8x32xf32>
    %cst_31 = arith.constant dense<0.000000e+00> : vector<8xf32>
    %87 = vector.multi_reduction <add>, %86, %cst_31 [1] : vector<8x32xf32> to vector<8xf32>
    %88 = vector.shape_cast %87 : vector<8xf32> to vector<8x1xf32>
    %cst_32 = arith.constant 1.000000e-24 : f32
    %89 = vector.broadcast %cst_32 : f32 to vector<8x1xf32>
    %90 = arith.maximumf %88, %89 : vector<8x1xf32>
    %91 = math.rsqrt %90 : vector<8x1xf32>
    %92 = vector.broadcast %91 : vector<8x1xf32> to vector<8x32xf32>
    %93 = arith.mulf %85, %92 : vector<8x32xf32>
    %cst_33 = arith.constant dense<0.000000e+00> : vector<8x8xf32>
    %94 = tpu.matmul %93, %93, %cst_33 {dimension_numbers = #tpu.dot_dimension_numbers<[1], [1], [0], [0], [0, 0, 1, 0], [], []>} : vector<8x32xf32>, vector<8x32xf32>, vector<8x8xf32> -> vector<8x8xf32>
    %c0_34 = arith.constant 0 : index
    %c0_35 = arith.constant 0 : index
    %95 = vector.load %arg2[%c0_34, %c0_35] : memref<8x1xi32, #tpu.memory_space<vmem>>, vector<8x1xi32>
    %96 = vector.broadcast %95 : vector<8x1xi32> to vector<8x8xi32>
    %97 = vector.broadcast %1 : vector<1x8xi32> to vector<8x8xi32>
    %98 = arith.cmpi eq, %96, %97 : vector<8x8xi32>
    %99 = arith.extui %98 : vector<8x8xi1> to vector<8x8xi32>
    %100 = arith.sitofp %99 : vector<8x8xi32> to vector<8x8xf32>
    %cst_36 = arith.constant 1.000000e+00 : f32
    %101 = vector.broadcast %cst_36 : f32 to vector<8x8xf32>
    %102 = arith.subf %101, %94 : vector<8x8xf32>
    %103 = arith.mulf %102, %100 : vector<8x8xf32>
    %cst_37 = arith.constant 5.000000e-01 : f32
    %104 = vector.broadcast %cst_37 : f32 to vector<8x8xf32>
    %105 = arith.subf %94, %104 : vector<8x8xf32>
    %cst_38 = arith.constant 0.000000e+00 : f32
    %106 = vector.broadcast %cst_38 : f32 to vector<8x8xf32>
    %107 = arith.maximumf %105, %106 : vector<8x8xf32>
    %cst_39 = arith.constant 1.000000e+00 : f32
    %108 = vector.broadcast %cst_39 : f32 to vector<8x8xf32>
    %109 = arith.subf %108, %100 : vector<8x8xf32>
    %110 = arith.mulf %107, %109 : vector<8x8xf32>
    %111 = vector.shape_cast %103 : vector<8x8xf32> to vector<1x8x8xf32>
    %cst_40 = arith.constant dense<0.000000e+00> : vector<1xf32>
    %112 = vector.multi_reduction <add>, %111, %cst_40 [1, 2] : vector<1x8x8xf32> to vector<1xf32>
    %113 = vector.shape_cast %112 : vector<1xf32> to vector<1x1x1xf32>
    %114 = vector.extract %113[0, 0, 0] : f32 from vector<1x1x1xf32>
    %115 = vector.shape_cast %110 : vector<8x8xf32> to vector<1x8x8xf32>
    %cst_41 = arith.constant dense<0.000000e+00> : vector<1xf32>
    %116 = vector.multi_reduction <add>, %115, %cst_41 [1, 2] : vector<1x8x8xf32> to vector<1xf32>
    %117 = vector.shape_cast %116 : vector<1xf32> to vector<1x1x1xf32>
    %118 = vector.extract %117[0, 0, 0] : f32 from vector<1x1x1xf32>
    %119 = arith.addf %114, %118 : f32
    %cst_42 = arith.constant 1.562500e-02 : f32
    %120 = arith.mulf %119, %cst_42 : f32
    %cst_43 = arith.constant 5.000000e-01 : f32
    %121 = arith.mulf %cst_43, %120 : f32
    %122 = arith.addf %84, %121 : f32
    %c0_44 = arith.constant 0 : index
    %c0_45 = arith.constant 0 : index
    %123 = memref.load %arg4[%c0_44, %c0_45] : memref<1x1xf32, #tpu.memory_space<smem>>
    memref.store %122, %arg4[%c0_44, %c0_45] : memref<1x1xf32, #tpu.memory_space<smem>>
    return
  }
}

</mosaic_0001>

<bundles_post_ra>
// kernel: tpu_custom_call.1
= control target key start
LH: loop header
LB: loop body
LE: loop exit
PB: predicated region body
PF: predicated region fallthrough
CT: control target
= control target key end

     0   :  { %vm132_vm0 = vcmask 261120   ;;  %s402_s0 = inlined_call_operand.vmem [shape: f32[4,8], index: 0, kind: input, shape index: {}]   ;;  %s403_s1 = inlined_call_operand.vmem [shape: s32[1,8], index: 1, kind: input, shape index: {}]   ;;  %s404_s2 = inlined_call_operand.vmem [shape: s32[8,1], index: 2, kind: input, shape index: {}]   ;;  %s405_s3 = inlined_call_operand.vmem [shape: f32[8,32], index: 3, kind: input, shape index: {}]   ;;  %s406_s4 = inlined_call_operand.hbm [shape: f32[1,1], index: 4, kind: output, shape index: {}]  }
   0x1   :  { %v348_v0 = vld [vmem:[%s405_s3] sm:$0xff] }
   0x2   :  { %9 = vsyncpa [#allocation3], 0  ;;  %v131_v1 = vmul.f32 %v348_v0, %v348_v0  ;;  %v18_v3 = vld [vmem:[%s402_s0] sm:$0xf]  ;;  %vm29_vm1 = vcmask 60416   ;;  %v316_v9 = vmov 0.0   ;;  %v20_v21 = vlaneseq }
   0x3   :  { %v30_v4 = vsel %vm29_vm1, %v18_v3, -inf  ;;  %272 = vmatprep.subr.mxu0 %v316_v9  ;;  %vm317_vm2 = vmmov 0   ;;  %v212_v14 = vld [vmem:[%s404_s2] sm:$0xff]  ;;  %v318_v15 = vmov 0   ;;  %vm90_vm8 = vcmask 57344   ;;  %s304_s10 = scalar_lea.hbm %s406_s4, 16 }
   0x4   :  { %v133_v2 = vsel %vm132_vm0, %v131_v1, 0.0  ;;  %v31_v5 = vrot.slane %v30_v4, 4  ;;  %274 = vmatprep.mubr.msk.f32.mxu0 %vm317_vm2, %v316_v9  ;;  %293 = vset.pattern.permute.xlu0 %v318_v15  ;;  %v21_v24 = vshrl.u32 %v20_v21, 7  ;;  %v19_v27 = vld [vmem:[%s403_s1] sm:$0x1]  ;;  %vm225_vm10 = vcmask 64512   ;;  %p305_p0 = scmp.ne.s32.totalorder %s406_s4, %s304_s10  ;;  %p308_p1 = scmp.lt.u32.totalorder %s304_s10, %s406_s4 }
   0x5   :  { %134 = vadd.xlane.f32.xlu0 %v133_v2  ;;  %vm76_vm4 = vcmp.eq.s32.totalorder %v19_v27, 0  ;;  %vm79_vm5 = vcmp.eq.s32.totalorder %v19_v27, 1  ;;  %vm82_vm6 = vcmp.eq.s32.totalorder %v19_v27, 2  ;;  %vm85_vm7 = vcmp.eq.s32.totalorder %v19_v27, 3 }
   0x6   :  { %v32_v6 = vmax.f32 %v30_v4, %v31_v5  ;;  %v24_v26 = vsub.s32 0, %v21_v24  ;;  %v78_v40 = vsel %vm76_vm4, 1.0, %v316_v9  ;;  %v77_v61 = vsel %vm76_vm4, 0.25, %v316_v9  ;;  %p310_p2 = pnand %p308_p1, %p305_p0 }
   0x7   :  { %v81_v44 = vsel %vm79_vm5, 2.0, %v78_v40  ;;  %v80_v62 = vsel %vm79_vm5, 0.5, %v77_v61 }
   0x8   :  { %v33_v7 = vrot.slane %v32_v6, 2  ;;  %v366_v28 = vrot.slane %v19_v27, %v24_v26  ;;  %v84_v48 = vsel %vm82_vm6, 1.5, %v81_v44  ;;  %v83_v1 = vsel %vm82_vm6, 0.75, %v80_v62 }
   0x9   :  { %v87_v52 = vsel %vm85_vm7, 1.0, %v84_v48  ;;  %v86_v4 = vsel %vm85_vm7, 1.0, %v83_v1 }
   0xa   :  { %v34_v8 = vmax.f32 %v32_v6, %v33_v7  ;;  %vm26_vm3 = vcmp.eq.s32.totalorder %v21_v24, %v366_v28 }
   0xb   :  { %v265_v31 = vsel %vm26_vm3, 1.0, %v316_v9 }
   0xc   :  { %v35_v10 = vrot.slane %v34_v8, 1 }
   0xe   :  { %v36_v11 = vmax.f32 %v34_v8, %v35_v10  ;;  %v113_v10 = vsel %vm90_vm8, %v87_v52, 0.0 }
  0x10   :  { %v37_v12 = vsub.f32 %v18_v3, %v36_v11 }
  0x12   :  { %v38_v13 = vmul.f32 1.442695, %v37_v12 }
  0x14   :  { %294 = vpow2.f32 %v38_v13 }
  0x1b   :  { %214 = vperm.xlu0 %293, %v212_v14  }
  0x1e   :  { %v295_v16 = vpop.eup %294 }
  0x1f   :  { %v40_v17 = vsel %vm29_vm1, %v295_v16, 0.0 }
  0x20   :  { %v41_v18 = vrot.slane %v40_v17, 4 }
  0x22   :  { %v42_v19 = vadd.f32 %v41_v18, %v40_v17 }
  0x24   :  { %v43_v20 = vrot.slane %v42_v19, 2 }
  0x26   :  { %v44_v22 = vadd.f32 %v43_v20, %v42_v19 }
  0x28   :  { %v45_v23 = vrot.slane %v44_v22, 1 }
  0x2a   :  { %v46_v25 = vadd.f32 %v45_v23, %v44_v22 }
  0x2c   :  { %296 = vlog2.f32 %v46_v25 }
  0x36   :  { %v297_v29 = vpop.eup %296 }
  0x37   :  { %v48_v30 = vmul.f32 0.6931472, %v297_v29 }
  0x39   :  { %v49_v32 = vsub.f32 %v37_v12, %v48_v30 }
  0x3b   :  { %v50_v33 = vmul.f32 %v265_v31, %v49_v32  ;;  %v59_v34 = vsel %vm29_vm1, %v49_v32, 0.0 }
  0x3c   :  { %v60_v35 = vrot.slane %v59_v34, 4 }
  0x3d   :  { %v51_v36 = vsel %vm29_vm1, %v50_v33, 0.0 }
  0x3e   :  { %v52_v37 = vrot.slane %v51_v36, 4  ;;  %v61_v38 = vadd.f32 %v60_v35, %v59_v34 }
  0x40   :  { %v53_v39 = vadd.f32 %v52_v37, %v51_v36  ;;  %v62_v41 = vrot.slane %v61_v38, 2 }
  0x42   :  { %v54_v42 = vrot.slane %v53_v39, 2  ;;  %v63_v43 = vadd.f32 %v62_v41, %v61_v38 }
  0x44   :  { %v55_v45 = vadd.f32 %v54_v42, %v53_v39  ;;  %v64_v46 = vrot.slane %v63_v43, 1 }
  0x46   :  { %v56_v47 = vrot.slane %v55_v45, 1  ;;  %v65_v49 = vadd.f32 %v64_v46, %v63_v43 }
  0x48   :  { %v57_v50 = vadd.f32 %v56_v47, %v55_v45  ;;  %v66_v51 = vsub.f32 0.0, %v65_v49 }
  0x4a   :  { %v58_v53 = vsub.f32 0.0, %v57_v50  ;;  %v68_v54 = vmul.f32 0.025, %v66_v51 }
  0x4c   :  { %v102_v55 = vmul.f32 %v87_v52, %v58_v53  ;;  %v67_v56 = vmul.f32 0.9, %v58_v53 }
  0x4e   :  { %v103_v57 = vsel %vm90_vm8, %v102_v55, 0.0  ;;  %v69_v58 = vadd.f32 %v68_v54, %v67_v56 }
  0x4f   :  { %104 = vadd.xlane.f32.xlu1 %v103_v57 }
  0x50   :  { %v70_v59 = vsub.f32 0.0, %v69_v58 }
  0x52   :  { %v71_v60 = vmul.f32 1.442695, %v70_v59 }
  0x54   :  { %298 = vpow2.f32 %v71_v60 }
  0x5e   :  { %v299_v63 = vpop.eup %298 }
  0x5f   :  { %v73_v2 = vsub.f32 1.0, %v299_v63 }
  0x61   :  { %v74_v3 = vmax.f32 %v73_v2, 0.0 }
  0x63   :  { %v75_v5 = vmul.f32 %v74_v3, %v74_v3 }
  0x65   :  { %v88_v6 = vmul.f32 %v86_v4, %v75_v5 }
  0x67   :  { %v89_v7 = vmul.f32 %v88_v6, %v69_v58 }
  0x69   :  { %v91_v8 = vsel %vm90_vm8, %v89_v7, 0.0 }
  0x6a   :  { %92 = vadd.xlane.f32.xlu1 %v91_v8 }
  0x6e   :  { %114 = vadd.xlane.f32.xlu1 %v113_v10 }
  0x92   :  { %v135_v11 = vpop.xlane.xlu0 %134 }
  0x93   :  { %v136_v12 = vmax.f32 %v135_v11, 1e-24 }
  0x95   :  { %300 = vrsqrt.f32 %v136_v12 }
  0x9a   :  { %v215_v38 = vpop.permute.xlu0 %214 }
  0x9b   :  { %vm216_vm9 = vcmp.eq.s32.totalorder %v215_v38, %v366_v28 }
  0x9c   :  { %v268_v39 = vsel %vm216_vm9, 1.0, %v316_v9 }
  0x9d   :  { %v223_v41 = vsub.f32 1.0, %v268_v39 }
  0x9f   :  { %v301_v13 = vpop.eup %300 }
  0xa0   :  { %v138_v14 = vmul.f32 %v301_v13, %v348_v0 }
  0xa2   :  { %273 = vmatpush3.xpose.msk.msra.mxu0 %vm132_vm0, %v138_v14 }
  0xa5   :  { %275 = vmatmul.mubr.msk.f32.vlgmr.msra.gmra.mrb[0].mxu0 %vm132_vm0, %v138_v14 }
  0xdc   :  { %v105_v15 = vpop.xlane.xlu1 %104 }
  0xdd   :  { %v106_v16 = vrot.slane %v105_v15, 4 }
  0xdf   :  { %v107_v17 = vadd.f32 %v106_v16, %v105_v15 }
  0xe1   :  { %v108_v18 = vrot.slane %v107_v17, 2 }
  0xe3   :  { %v109_v21 = vadd.f32 %v108_v18, %v107_v17 }
  0xe5   :  { %v110_v26 = vrot.slane %v109_v21, 1 }
  0xe7   :  { %v111_v31 = vadd.f32 %v110_v26, %v109_v21 }
  0xf7   :  { %v93_v19 = vpop.xlane.xlu1 %92 }
  0xf8   :  { %v94_v20 = vrot.slane %v93_v19, 4 }
  0xfa   :  { %v95_v22 = vadd.f32 %v94_v20, %v93_v19 }
  0xfb   :  { %v115_v23 = vpop.xlane.xlu1 %114 }
  0xfc   :  { %v96_v24 = vrot.slane %v95_v22, 2  ;;  %v116_v25 = vrot.slane %v115_v23, 4 }
  0xfe   :  { %v117_v27 = vadd.f32 %v116_v25, %v115_v23  ;;  %v97_v29 = vadd.f32 %v96_v24, %v95_v22 }
 0x100   :  { %v118_v30 = vrot.slane %v117_v27, 2  ;;  %v98_v0 = vrot.slane %v97_v29, 1 }
 0x102   :  { %v99_v32 = vadd.f32 %v98_v0, %v97_v29  ;;  %v119_v33 = vadd.f32 %v118_v30, %v117_v27 }
 0x104   :  { %277 = vpush %v99_v32  ;;  %v120_v34 = vrot.slane %v119_v33, 1 }
 0x105   :  { %279 = vpush %v111_v31 }
 0x106   :  { %v121_v35 = vadd.f32 %v120_v34, %v119_v33 }
 0x108   :  { %281 = vpush %v121_v35 }
 0x135   :  { %s278_s1 = spop %277 }
 0x136   :  { %s280_s2 = spop %279  ;;  %s101_s22 = smul.f32 0.125, %s278_s1 }
 0x138   :  { %s127_s23 = smul.f32 0.7, %s101_s22 }
 0x139   :  { %s282_s21 = spop %281 }
 0x13a   :  { %v123_v36 = vstv %s282_s21 }
 0x13b   :  { %302 = vrcp.f32 %v123_v36 }
 0x145   :  { %v303_v37 = vpop.eup %302 }
 0x146   :  { %283 = vpush %v303_v37 }
 0x177   :  { %s284_s24 = spop %283 }
 0x178   :  { %v208_v40 = vpop.f32.mrb[0].mxu0  ;;  %s126_s25 = smul.f32 %s284_s24, %s280_s2 }
 0x179   :  { %v219_v42 = vsub.f32 1.0, %v208_v40  ;;  %v269_v43 = vadd.f32 -0.5, %v208_v40  ;;  %v276_v44 = vpop.f32.mrb[1].mxu0 }
 0x17a   :  { %s128_s26 = smul.f32 0.3, %s126_s25 }
 0x17b   :  { %v222_v45 = vmax.f32 %v269_v43, 0.0  ;;  %v220_v46 = vmul.f32 %v268_v39, %v219_v42 }
 0x17c   :  { %s129_s27 = sadd.f32 %s128_s26, %s127_s23 }
 0x17d   :  { %v226_v47 = vsel %vm225_vm10, %v220_v46, 0.0  ;;  %v224_v48 = vmul.f32 %v223_v41, %v222_v45 }
 0x17e   :  { %227 = vadd.xlane.f32.xlu1 %v226_v47 }
 0x17f   :  { %v236_v49 = vsel %vm225_vm10, %v224_v48, 0.0 }
 0x182   :  { %237 = vadd.xlane.f32.xlu1 %v236_v49 }
 0x20b   :  { %v228_v9 = vpop.xlane.xlu1 %227 }
 0x20c   :  { %v229_v28 = vrot.slane %v228_v9, 4 }
 0x20e   :  { %v230_v50 = vadd.f32 %v229_v28, %v228_v9 }
 0x20f   :  { %v238_v51 = vpop.xlane.xlu1 %237 }
 0x210   :  { %v231_v52 = vrot.slane %v230_v50, 2  ;;  %v239_v53 = vrot.slane %v238_v51, 4 }
 0x212   :  { %v240_v54 = vadd.f32 %v239_v53, %v238_v51  ;;  %v232_v55 = vadd.f32 %v231_v52, %v230_v50 }
 0x214   :  { %v241_v56 = vrot.slane %v240_v54, 2  ;;  %v233_v57 = vrot.slane %v232_v55, 1 }
 0x216   :  { %v242_v58 = vadd.f32 %v241_v56, %v240_v54  ;;  %v234_v59 = vadd.f32 %v233_v57, %v232_v55 }
 0x218   :  { %285 = vpush %v234_v59  ;;  %v243_v60 = vrot.slane %v242_v58, 1 }
 0x21a   :  { %v244_v61 = vadd.f32 %v243_v60, %v242_v58 }
 0x21c   :  { %287 = vpush %v244_v61 }
 0x249   :  { %s286_s28 = spop %285 }
 0x24d   :  { %s288_s29 = spop %287 }
 0x24e   :  { %s246_s30 = sadd.f32 %s288_s29, %s286_s28 }
 0x250   :  { %s247_s5 = smul.f32 0.015625, %s246_s30 }
 0x252   :  { %s248_s6 = smul.f32 0.5, %s247_s5 }
 0x254   :  { %s249_s7 = sadd.f32 %s248_s6, %s129_s27 }
 0x256   :  { %251 = sst [smem:[#allocation2]] %s249_s7 }
 0x257   :  { %313 = shalt.err (!%p310_p2)
}
 0x258   :  { %s319_s15 = smov [#allocation2]  }
 0x259   :  { %259 = dma.smem_to_hbm %s319_s15, 16, %s406_s4, [#allocation3]  }
 0x25a   :  { %314 = dma.done.wait [#allocation3], 16  }
 0x25b   :  { %315 = vsyncadd [#allocation3], 4294967280 }
 0x25c   :  { %263 = sfence }
 0x25d   :  { %264 = vsyncpa [#allocation3], 1 }

</bundles_post_ra>
